<compile_context>
chip_gen: v7x
topology: tpu7x:2x2x1
jax: 0.10.0
libtpu: 0.0.40
codegen_flags: <defaults>
</compile_context>

<pallas_src>
import functools

import jax
import jax.numpy as jnp
from jax import lax
from jax.experimental import pallas as pl
from jax.experimental.pallas import tpu as pltpu


def _round_up(x, m):
    return ((x + m - 1) // m) * m


def _upconv_matmul_kernel(x_ref, w_ref, b_ref, o_ref):
    # x_ref: (TM, C_in)     compute_dtype  activation tile
    # w_ref: (C_in, No_pad) compute_dtype  flattened ConvTranspose2d weight
    # b_ref: (1, No_pad)    f32            per-column bias
    # o_ref: (TM, No_pad)   out_dtype      output tile
    acc = jnp.dot(x_ref[...], w_ref[...], preferred_element_type=jnp.float32)
    o_ref[...] = (acc + b_ref[...]).astype(o_ref.dtype)


def _vmem_capacity_bytes():
    try:
        return int(pltpu.get_tpu_info().vmem_capacity_bytes)
    except Exception:
        return 64 * 1024 * 1024  # conservative (v7x-sized) fallback


def up_forward(x1, x2, weight, bias, *, tile_m=None,
               compute_dtype=jnp.bfloat16, out_dtype=jnp.bfloat16,
               channels_last=False):
    """Pallas equivalent of Up.forward(x1, x2).

    Args:
      x1:     (N, out_ch, H1, W1)   -- only its spatial size is used
      x2:     (N, in_ch,  H2, W2)
      weight: (in_ch, out_ch, 2, 2) -- PyTorch ConvTranspose2d weight layout
      bias:   (out_ch,)
    Returns:
      (N, out_ch, H1, W1) in out_dtype (or (N, H1, W1, out_ch) if channels_last)
    """
    N, C_in, H2, W2 = x2.shape
    C_out = weight.shape[1]
    H1, W1 = x1.shape[2], x1.shape[3]

    M = N * H2 * W2
    No = C_out * 4
    c_isz = jnp.dtype(compute_dtype).itemsize
    o_isz = jnp.dtype(out_dtype).itemsize

    # ---- wrapper-side layout glue (XLA) ------------------------------------
    # Cast BEFORE the NCHW->NHWC relayout so the copy moves compute_dtype bytes.
    x_flat = jnp.transpose(x2.astype(compute_dtype), (0, 2, 3, 1)).reshape(M, C_in)
    # Weight columns ordered (p, q, co): column = (p*2+q)*C_out + co.
    w_flat = jnp.transpose(weight, (0, 2, 3, 1)).reshape(C_in, No).astype(compute_dtype)
    b_flat = jnp.tile(bias.astype(jnp.float32), 4).reshape(1, No)

    if No < 128:
        # Small-channel guard: padding columns to 128 would move 8x the needed
        # output bytes purely for lane-dense stores; plain XLA dot wins here.
        acc = jnp.dot(x_flat, w_flat, preferred_element_type=jnp.float32)
        out_cols = (acc + b_flat).astype(out_dtype)
    else:
        No_pad = _round_up(No, 128)

        # Generation-aware tile sizing & explicit VMEM budget.
        vmem_cap = _vmem_capacity_bytes()
        if tile_m is None:
            tile_m = 1024 if vmem_cap >= (128 << 20) else 512
        budget = int(vmem_cap * 0.7)

        TM = _round_up(min(tile_m, _round_up(M, 16)), 16)

        def working_set(t):
            return (C_in * No_pad * c_isz          # weight, single-buffered
                    + 8 * No_pad * 4               # bias row (sublane-padded)
                    + 2 * t * C_in * c_isz         # activation double-buffer
                    + 2 * t * No_pad * o_isz)      # output double-buffer

        while TM > 16 and working_set(TM) > budget:
            TM = _round_up(TM // 2, 16)
        M_pad = _round_up(M, TM)
        vmem_limit = int(min(int(vmem_cap * 0.9),
                             max(working_set(TM) + (8 << 20), 32 << 20)))

        x_pal = jnp.pad(x_flat, ((0, M_pad - M), (0, 0))) if M_pad != M else x_flat
        if No_pad != No:
            w_pal = jnp.pad(w_flat, ((0, 0), (0, No_pad - No)))
            b_pal = jnp.pad(b_flat, ((0, 0), (0, No_pad - No)))
        else:
            w_pal, b_pal = w_flat, b_flat

        # Advisory cost: UNPADDED flops/bytes, actual output itemsize.
        cost = pl.CostEstimate(
            flops=2 * M * C_in * No,
            transcendentals=0,
            bytes_accessed=(M * C_in * c_isz + C_in * No * c_isz + No * 4
                            + M * No * o_isz),
        )

        out_flat = pl.pallas_call(
            _upconv_matmul_kernel,
            out_shape=jax.ShapeDtypeStruct((M_pad, No_pad), out_dtype),
            grid=(M_pad // TM,),
            in_specs=[
                # TODO(synk): sweep pipeline_mode=pl.Buffered(3) here on v7x if
                # the trace shows exposed DMA on the M-tiled activation stream.
                pl.BlockSpec((TM, C_in), lambda i: (i, 0)),
                pl.BlockSpec((C_in, No_pad), lambda i: (0, 0),
                             pipeline_mode=pl.Buffered(1)),   # grid-invariant
                pl.BlockSpec((1, No_pad), lambda i: (0, 0),
                             pipeline_mode=pl.Buffered(1)),   # grid-invariant
            ],
            out_specs=pl.BlockSpec((TM, No_pad), lambda i: (i, 0)),
            compiler_params=pltpu.CompilerParams(
                dimension_semantics=("parallel",),
                vmem_limit_bytes=vmem_limit,
            ),
            cost_estimate=cost,
        )(x_pal, w_pal, b_pal)
        out_cols = out_flat[:M, :No]

    # Scatter the 2x2 expansion; columns are (p, q, co) ordered.
    y6 = out_cols.reshape(N, H2, W2, 2, 2, C_out)   # (n, i, j, p, q, co)
    diffY = H1 - 2 * H2
    diffX = W1 - 2 * W2
    if channels_last:
        y = jnp.transpose(y6, (0, 1, 3, 2, 4, 5)).reshape(N, 2 * H2, 2 * W2, C_out)
        pads = [(0, 0, 0),
                (diffY // 2, diffY - diffY // 2, 0),
                (diffX // 2, diffX - diffX // 2, 0),
                (0, 0, 0)]
    else:
        y = jnp.transpose(y6, (0, 5, 1, 3, 2, 4)).reshape(N, C_out, 2 * H2, 2 * W2)
        pads = [(0, 0, 0), (0, 0, 0),
                (diffY // 2, diffY - diffY // 2, 0),
                (diffX // 2, diffX - diffX // 2, 0)]
    # F.pad semantics: negative amounts crop (lax.pad supports that, jnp.pad doesn't).
    return lax.pad(y, jnp.array(0, y.dtype), pads)


def _reference(x1, x2, weight, bias, compute_dtype=jnp.bfloat16):
    """Pure-JAX f32 reference (bf16 operand cast to match the compute path)."""
    N, C_in, H2, W2 = x2.shape
    C_out = weight.shape[1]
    H1, W1 = x1.shape[2], x1.shape[3]
    x2c = x2.astype(compute_dtype).astype(jnp.float32)
    wc = weight.astype(compute_dtype).astype(jnp.float32)
    # out[n, co, 2i+p, 2j+q] = sum_ci x2[n,ci,i,j] * W[ci,co,p,q] + b[co]
    y = jnp.einsum("ncij,copq->noipjq", x2c, wc)
    y = y + bias.astype(jnp.float32)[None, :, None, None, None, None]
    y = y.reshape(N, C_out, 2 * H2, 2 * W2)
    diffY = H1 - 2 * H2
    diffX = W1 - 2 * W2
    return lax.pad(y, jnp.array(0.0, jnp.float32),
                   [(0, 0, 0), (0, 0, 0),
                    (diffY // 2, diffY - diffY // 2, 0),
                    (diffX // 2, diffX - diffX // 2, 0)])


if __name__ == "__main__":
    key = jax.random.PRNGKey(0)
    k_x1, k_x2, k_w, k_b = jax.random.split(key, 4)

    # Main path: out_ch*4 = 128 -> lane-dense Pallas kernel, no column padding.
    in_ch, out_ch = 16, 32
    N, H2, W2 = 2, 8, 8
    H1, W1 = 17, 15          # diffY=+1 (pads), diffX=-1 (crops)

    x1 = jax.random.normal(k_x1, (N, out_ch, H1, W1), dtype=jnp.float32)
    x2 = jax.random.normal(k_x2, (N, in_ch, H2, W2), dtype=jnp.float32)
    weight = jax.random.normal(k_w, (in_ch, out_ch, 2, 2), dtype=jnp.float32) * 0.1
    bias = jax.random.normal(k_b, (out_ch,), dtype=jnp.float32) * 0.1

    fwd = jax.jit(up_forward)
    out = jax.block_until_ready(fwd(x1, x2, weight, bias))
    ref = _reference(x1, x2, weight, bias)
    assert out.shape == (N, out_ch, H1, W1), out.shape
    assert jnp.allclose(out.astype(jnp.float32), ref, atol=2e-2, rtol=2e-2), \
        "Pallas path mismatch vs reference"

    # Channels-last output variant (same kernel, cheap interleave, no channel transpose).
    fwd_cl = jax.jit(functools.partial(up_forward, channels_last=True))
    out_cl = jax.block_until_ready(fwd_cl(x1, x2, weight, bias))
    assert out_cl.shape == (N, H1, W1, out_ch), out_cl.shape
    assert jnp.array_equal(jnp.transpose(out_cl, (0, 3, 1, 2)), out), \
        "channels_last path mismatch vs NCHW path"

    # Small-No guard path (out_ch*4 < 128 -> XLA fallback, no pad traffic).
    out_ch_s = 4
    x1_s = jax.random.normal(k_x1, (N, out_ch_s, H1, W1), dtype=jnp.float32)
    w_s = jax.random.normal(k_w, (in_ch, out_ch_s, 2, 2), dtype=jnp.float32) * 0.1
    b_s = jax.random.normal(k_b, (out_ch_s,), dtype=jnp.float32) * 0.1
    out_s = jax.block_until_ready(fwd(x1_s, x2, w_s, b_s))
    ref_s = _reference(x1_s, x2, w_s, b_s)
    assert out_s.shape == (N, out_ch_s, H1, W1), out_s.shape
    assert jnp.allclose(out_s.astype(jnp.float32), ref_s, atol=2e-2, rtol=2e-2), \
        "fallback path mismatch vs reference"

    print("KERNEL_OK")
</pallas_src>

<mosaic_0001>
module attributes {stable_mosaic.version = 11 : i64} {
  func.func @_upconv_matmul_kernel(%arg0: i32, %arg1: memref<128x16xbf16, #tpu.memory_space<vmem>>, %arg2: memref<16x128xbf16, #tpu.memory_space<vmem>>, %arg3: memref<1x128xf32, #tpu.memory_space<vmem>>, %arg4: memref<128x128xbf16, #tpu.memory_space<vmem>>) attributes {dimension_semantics = [#tpu.dimension_semantics<parallel>], iteration_bounds = array<i64: 1>, scalar_prefetch = 0 : i64, scratch_operands = 0 : i64, tpu.core_type = #tpu.core_type<tc>, window_params = [{transform_indices = @transform_0, window_bounds = array<i64: 128, 16>}, {pipeline_mode = #tpu.pipeline_mode<synchronous>, transform_indices = @transform_1, window_bounds = array<i64: 16, 128>}, {pipeline_mode = #tpu.pipeline_mode<synchronous>, transform_indices = @transform_2, window_bounds = array<i64: 1, 128>}, {transform_indices = @transform_3, window_bounds = array<i64: 128, 128>}]} {
    %c0 = arith.constant 0 : index
    %c0_0 = arith.constant 0 : index
    %0 = vector.load %arg1[%c0, %c0_0] : memref<128x16xbf16, #tpu.memory_space<vmem>>, vector<128x16xbf16>
    %c0_1 = arith.constant 0 : index
    %c0_2 = arith.constant 0 : index
    %1 = vector.load %arg2[%c0_1, %c0_2] : memref<16x128xbf16, #tpu.memory_space<vmem>>, vector<16x128xbf16>
    %cst = arith.constant dense<0.000000e+00> : vector<128x128xf32>
    %2 = tpu.matmul %0, %1, %cst {dimension_numbers = #tpu.dot_dimension_numbers<[1], [0], [0], [1], [0, 0, 1, 1], [], []>} : vector<128x16xbf16>, vector<16x128xbf16>, vector<128x128xf32> -> vector<128x128xf32>
    %c0_3 = arith.constant 0 : index
    %c0_4 = arith.constant 0 : index
    %3 = vector.load %arg3[%c0_3, %c0_4] : memref<1x128xf32, #tpu.memory_space<vmem>>, vector<1x128xf32>
    %4 = vector.broadcast %3 : vector<1x128xf32> to vector<128x128xf32>
    %5 = arith.addf %2, %4 : vector<128x128xf32>
    %6 = arith.truncf %5 : vector<128x128xf32> to vector<128x128xbf16>
    %c0_5 = arith.constant 0 : index
    %c0_6 = arith.constant 0 : index
    %7 = vector.load %arg4[%c0_5, %c0_6] : memref<128x128xbf16, #tpu.memory_space<vmem>>, vector<128x128xbf16>
    tpu.vector_store %arg4[%c0_5, %c0_6], %6 {strides = array<i32>} : memref<128x128xbf16, #tpu.memory_space<vmem>>, vector<128x128xbf16>,
    return
  }
  func.func @transform_0(%arg0: i32) -> (i32, i32) {
    %c0_i32 = arith.constant 0 : i32
    %c0_i32_0 = arith.constant 0 : i32
    return %arg0, %c0_i32 : i32, i32
  }
  func.func @transform_1(%arg0: i32) -> (i32, i32) {
    %c0_i32 = arith.constant 0 : i32
    %c0_i32_0 = arith.constant 0 : i32
    %c0_i32_1 = arith.constant 0 : i32
    return %c0_i32, %c0_i32_0 : i32, i32
  }
  func.func @transform_2(%arg0: i32) -> (i32, i32) {
    %c0_i32 = arith.constant 0 : i32
    %c0_i32_0 = arith.constant 0 : i32
    %c0_i32_1 = arith.constant 0 : i32
    return %c0_i32, %c0_i32_0 : i32, i32
  }
  func.func @transform_3(%arg0: i32) -> (i32, i32) {
    %c0_i32 = arith.constant 0 : i32
    %c0_i32_0 = arith.constant 0 : i32
    return %arg0, %c0_i32 : i32, i32
  }
}

</mosaic_0001>

<bundles_post_ra>
// kernel: tile.8
= control target key start
LH: loop header
LB: loop body
LE: loop exit
PB: predicated region body
PF: predicated region fallthrough
CT: control target
= control target key end

     0   :  { %s22_s0 = inlined_call_operand.vmem [shape: f32[32], index: 0, kind: input, shape index: {}]   ;;  %s23_s1 = inlined_call_operand.vmem [shape: f32[4,32], index: 1, kind: output, shape index: {}]  }
   0x1   :  { %v4_v0 = vld [vmem:[%s22_s0] ss:$0 sm:$0xff] }
   0x2   :  { %5 = vst [vmem:[%s23_s1] sm:$0xf] %v4_v0 }

// kernel: tile.9
= control target key start
LH: loop header
LB: loop body
LE: loop exit
PB: predicated region body
PF: predicated region fallthrough
CT: control target
= control target key end

     0   :  { %vm7_vm0 = vcmask 261120   ;;  %s37_s8 = smov 32   ;;  %s38_s9 = smov 64   ;;  %vm13_vm1 = vcmask 1048320   ;;  %vm19_vm2 = vcmask 785920   ;;  %vm25_vm3 = vcmask 523520   ;;  %s55_s0 = inlined_call_operand.vmem [shape: f32[4,32], index: 0, kind: input, shape index: {}]   ;;  %s56_s1 = inlined_call_operand.vmem [shape: f32[1,128], index: 1, kind: output, shape index: {}]  }
   0x1   :  { %v4_v0 = vld [vmem:[%s55_s0] sm:$0xf]  ;;  %s36_s0 = smov 96  }
   0x2   :  { %5 = vst [vmem:[#allocation1] sm:$0xf] %v4_v0 }
   0x9   :  { %v10_v1 = vld [vmem:[#allocation1 + $0x3] sm:$0x1]   ;;  %v22_v2 = vld [vmem:[#allocation1 + $0x1] sm:$0x1]   ;;  %v6_v3 = vld [vmem:[#allocation1] sm:$0x1]  }
   0xa   :  { %11 = vrot.lane.b32.xlu0 %v10_v1, %s36_s0  ;;  %23 = vrot.lane.b32.xlu1 %v22_v2, %s37_s8  ;;  %v16_v4 = vld [vmem:[#allocation1 + $0x2] sm:$0x1]   ;;  %8 = vst.msk [vmem:[#allocation0] sm:$0x1] %vm7_vm0, %v6_v3  }
   0xe   :  { %17 = vrot.lane.b32.xlu0 %v16_v4, %s38_s9 }
  0x7c   :  { %v12_v5 = vpop.permute.xlu0 %11   ;;  %v24_v6 = vpop.permute.xlu1 %23  }
  0x7d   :  { %14 = vst.msk [vmem:[#allocation0] sm:$0x1] %vm13_vm1, %v12_v5  }
  0x80   :  { %v18_v7 = vpop.permute.xlu0 %17  }
  0x81   :  { %20 = vst.msk [vmem:[#allocation0] sm:$0x1] %vm19_vm2, %v18_v7  }
  0x82   :  { %26 = vst.msk [vmem:[#allocation0] sm:$0x1] %vm25_vm3, %v24_v6  }
  0x89   :  { %v30_v8 = vld [vmem:[#allocation0] sm:$0x1] }
  0x8a   :  { %32 = vst [vmem:[%s56_s1] sm:$0x1] %v30_v8 }

// kernel: up_forward.1
= control target key start
LH: loop header
LB: loop body
LE: loop exit
PB: predicated region body
PF: predicated region fallthrough
CT: control target
= control target key end

     0   :  { %vm86_vm0 = vcmask 130048   ;;  %s509_s1 = inlined_call_operand.vmem [shape: bf16[16,128], index: 1, kind: input, shape index: {}]   ;;  %s510_s0 = inlined_call_operand.vmem [shape: bf16[128,16], index: 0, kind: input, shape index: {}]   ;;  %s511_s2 = inlined_call_operand.vmem [shape: f32[1,128], index: 2, kind: input, shape index: {}]   ;;  %s512_s3 = inlined_call_operand.vmem [shape: bf16[128,128], index: 3, kind: output, shape index: {}]  }
   0x1   :  { %v418_v0 = vld [vmem:[%s509_s1] sm:$0xff]   ;;  %v421_v3 = vld [vmem:[%s510_s0 + $0x8] sm:$0xff]   ;;  %v423_v5 = vld [vmem:[%s510_s0 + $0x10] sm:$0xff]  }
   0x2   :  { %v419_v1 = vld [vmem:[%s510_s0] sm:$0xff]   ;;  %398 = vmatprep.subr.bf16.mxu0 %v418_v0  ;;  %416 = vmatprep.subr.bf16.mxu1 %v418_v0  ;;  %v422_v4 = vld [vmem:[%s510_s0 + $0x28] sm:$0xff]   ;;  %v424_v6 = vld [vmem:[%s510_s0 + $0x30] sm:$0xff]  }
   0x3   :  { %v420_v2 = vld [vmem:[%s510_s0 + $0x20] sm:$0xff]   ;;  %399 = vmatpush3.bf16.msra.mxu0 %v418_v0  ;;  %417 = vmatpush3.bf16.msra.mxu1 %v418_v0  ;;  %v425_v7 = vld [vmem:[%s510_s0 + $0x18] sm:$0xff]  }
   0x4   :  { %400 = vmatprep.mubr.msk.bf16.mxu0 %vm86_vm0, %v419_v1  ;;  %408 = vmatprep.mubr.msk.bf16.mxu1 %vm86_vm0, %v420_v2  ;;  %v426_v8 = vld [vmem:[%s510_s0 + $0x38] sm:$0xff]   ;;  %v292_v10 = vld [vmem:[%s511_s2] ss:$0 sm:$0xff] }
   0x6   :  { %401 = vmatmul.mubr.msk.bf16.vlgmr.msra.gmra.mrb[0].mxu0 %vm86_vm0, %v421_v3  ;;  %409 = vmatmul.mubr.msk.bf16.vlgmr.msra.gmra.mrb[0].mxu1 %vm86_vm0, %v422_v4 }
   0x7   :  { %404 = vmatprep.mubr.msk.bf16.mxu0 %vm86_vm0, %v423_v5  ;;  %412 = vmatprep.mubr.msk.bf16.mxu1 %vm86_vm0, %v424_v6 }
   0xe   :  { %405 = vmatmul.mubr.msk.bf16.gmra.mrb[4].mxu0 %vm86_vm0, %v425_v7  ;;  %413 = vmatmul.mubr.msk.bf16.gmra.mrb[4].mxu1 %vm86_vm0, %v426_v8 }
  0xd9   :  { %v402_v9 = vpop.f32.mrb[0].mxu0  ;;  %v410_v11 = vpop.f32.mrb[0].mxu1 }
  0xda   :  { %v145_v12 = vpop.f32.mrb[1].mxu0  ;;  %v177_v13 = vpop.f32.mrb[1].mxu1  ;;  %v154_v16 = vadd.f32 %v402_v9, %v292_v10  ;;  %v186_v17 = vadd.f32 %v410_v11, %v292_v10 }
  0xdb   :  { %v403_v14 = vpop.f32.mrb[2].mxu0  ;;  %v411_v15 = vpop.f32.mrb[2].mxu1  ;;  %v146_v22 = vadd.f32 %v292_v10, %v145_v12  ;;  %v178_v23 = vadd.f32 %v292_v10, %v177_v13 }
  0xdc   :  { %v157_v18 = vadd.f32 %v403_v14, %v292_v10  ;;  %v189_v19 = vadd.f32 %v411_v15, %v292_v10  ;;  %v148_v20 = vpop.f32.mrb[3].mxu0  ;;  %v180_v21 = vpop.f32.mrb[3].mxu1 }
  0xdd   :  { %v149_v24 = vadd.f32 %v292_v10, %v148_v20  ;;  %v181_v25 = vadd.f32 %v292_v10, %v180_v21 }
  0xde   :  { %v350_v26 = vpack.c.bf16 %v157_v18, %v154_v16  ;;  %v370_v27 = vpack.c.bf16 %v189_v19, %v186_v17 }
  0xdf   :  { %v345_v28 = vpack.c.bf16 %v149_v24, %v146_v22  ;;  %v365_v29 = vpack.c.bf16 %v181_v25, %v178_v23 }
  0xe0   :  { %382 = vst [vmem:[%s512_s3 + $0x8] sm:$0xff] %v350_v26   ;;  %386 = vst [vmem:[%s512_s3 + $0x28] sm:$0xff] %v370_v27  }
  0xe1   :  { %346 = vst [vmem:[%s512_s3] sm:$0xff] %v345_v28   ;;  %385 = vst [vmem:[%s512_s3 + $0x20] sm:$0xff] %v365_v29   ;;  %v406_v30 = vpop.f32.mrb[4].mxu0  ;;  %v414_v31 = vpop.f32.mrb[4].mxu1 }
  0xe2   :  { %v161_v32 = vpop.f32.mrb[5].mxu0  ;;  %v193_v33 = vpop.f32.mrb[5].mxu1  ;;  %v170_v36 = vadd.f32 %v406_v30, %v292_v10  ;;  %v202_v37 = vadd.f32 %v414_v31, %v292_v10 }
  0xe3   :  { %v407_v34 = vpop.f32.mrb[6].mxu0  ;;  %v415_v35 = vpop.f32.mrb[6].mxu1  ;;  %v162_v42 = vadd.f32 %v292_v10, %v161_v32  ;;  %v194_v43 = vadd.f32 %v292_v10, %v193_v33 }
  0xe4   :  { %v173_v38 = vadd.f32 %v407_v34, %v292_v10  ;;  %v205_v39 = vadd.f32 %v415_v35, %v292_v10  ;;  %v164_v40 = vpop.f32.mrb[7].mxu0  ;;  %v196_v41 = vpop.f32.mrb[7].mxu1 }
  0xe5   :  { %v165_v44 = vadd.f32 %v292_v10, %v164_v40  ;;  %v197_v45 = vadd.f32 %v292_v10, %v196_v41 }
  0xe6   :  { %v360_v46 = vpack.c.bf16 %v173_v38, %v170_v36  ;;  %v380_v47 = vpack.c.bf16 %v205_v39, %v202_v37 }
  0xe7   :  { %v355_v48 = vpack.c.bf16 %v165_v44, %v162_v42  ;;  %v375_v49 = vpack.c.bf16 %v197_v45, %v194_v43 }
  0xe8   :  { %384 = vst [vmem:[%s512_s3 + $0x18] sm:$0xff] %v360_v46   ;;  %388 = vst [vmem:[%s512_s3 + $0x38] sm:$0xff] %v380_v47  }
  0xe9   :  { %383 = vst [vmem:[%s512_s3 + $0x10] sm:$0xff] %v355_v48   ;;  %387 = vst [vmem:[%s512_s3 + $0x30] sm:$0xff] %v375_v49  }

</bundles_post_ra>
